<compile_context>
chip_gen: v6e
topology: v6e:2x2x1
jax: 0.10.0
libtpu: 0.0.40
codegen_flags: <defaults>
</compile_context>

<pallas_src>
import math
import itertools

import numpy as np
import jax
import jax.numpy as jnp
from jax import lax
from jax.experimental import pallas as pl
from jax.experimental.pallas import tpu as pltpu

LANE = 128                  # vreg lane width (last dim)
SUBLANE = 8                 # f32 sublane width (second-to-last dim)
MXU_DTYPE = jnp.bfloat16    # matmul-input dtype (f32 accumulation everywhere)
OUT_DTYPE = jnp.bfloat16    # HBM output dtype (halves output traffic)
LN_EPS = 1e-5               # torch.nn.LayerNorm default


def _round_up(x, m):
    return (x + m - 1) // m * m


# ----------------------------------------------------------------------------
# Mask construction (matches make_mask(..., mask_type='densest') semantics)
# ----------------------------------------------------------------------------
def make_mask_densest(in_dim, out_dim):
    assert out_dim < 2 ** in_dim
    assert in_dim > 0 and out_dim > 0
    mask = np.ones((out_dim, in_dim), dtype=np.float32)
    if out_dim == 1:
        return mask
    row_idx = 1
    for nz in range(1, in_dim):
        for zeros_in_row in itertools.combinations(range(in_dim), nz):
            mask[row_idx, list(zeros_in_row)] = 0.0
            row_idx += 1
            if row_idx >= out_dim:
                return mask
    return mask


# ----------------------------------------------------------------------------
# Parameter construction for SparseLinear / SparseMLP
# ----------------------------------------------------------------------------
def init_sparse_linear(key, in_dim, out_dim, mask_constant=1.0):
    """Effective (masked) weight [out_dim, in_dim] and bias [out_dim] in f32."""
    k_w, k_nm, k_b = jax.random.split(key, 3)
    mask = jnp.asarray(make_mask_densest(in_dim, out_dim))
    # kaiming_uniform_(a=sqrt(5)) on [out, in] -> bound = 1/sqrt(fan_in)
    bound = 1.0 / math.sqrt(in_dim)
    weight = jax.random.uniform(k_w, (out_dim, in_dim), jnp.float32, -bound, bound)
    # do_normal_mask=True: standard-normal "noise" for the masked-out entries.
    n_mask = jax.random.normal(k_nm, (out_dim, in_dim), jnp.float32)
    # Effective weight exactly as SparseLinear applies it before F.linear.
    w_eff = weight * mask + (1.0 - mask) * mask_constant * n_mask
    bias = jax.random.uniform(k_b, (out_dim,), jnp.float32, -bound, bound)
    return w_eff, bias


def init_sparse_mlp(key, in_dim, hidden_dim, out_dim, num_layers):
    assert num_layers >= 2
    dims = [in_dim] + [hidden_dim] * (num_layers - 1) + [out_dim]
    keys = jax.random.split(key, num_layers)
    layers = []
    for i in range(num_layers):
        d_in, d_out = dims[i], dims[i + 1]
        d_out_p = _round_up(d_out, LANE)
        # Layer 0 keeps its TRUE contracting dim (matches the true-width input
        # block -> smaller DMA, fewer MXU pushes).  Deeper layers pad K to the
        # lane width because the in-VMEM activations are kept lane-padded; the
        # padded lanes are exactly 0, so the matmul is exact.
        d_in_k = d_in if i == 0 else _round_up(d_in, LANE)
        w_eff, bias = init_sparse_linear(keys[i], d_in, d_out)      # f32
        # Pre-transpose to [in, out] for x @ W, zero-pad, cast to bf16 ONCE
        # (the masked-weight math stays f32).
        w_t = jnp.zeros((d_in_k, d_out_p), jnp.float32)
        w_t = w_t.at[:d_in, :d_out].set(jnp.transpose(w_eff))
        b_p = jnp.zeros((1, d_out_p), jnp.float32).at[:, :d_out].set(bias)
        layer = {"w_t": w_t.astype(MXU_DTYPE), "b": b_p,
                 "d_in": d_in, "d_out": d_out}
        if i < num_layers - 1:
            # torch LayerNorm init: gamma=1, beta=0.  Padded lanes stay 0 so
            # the padded tail of the activation remains exactly 0.
            layer["gamma"] = jnp.zeros((1, d_out_p), jnp.float32).at[:, :d_out].set(1.0)
            layer["beta"] = jnp.zeros((1, d_out_p), jnp.float32)
        layers.append(layer)
    return layers


# ----------------------------------------------------------------------------
# Fused Pallas kernel: [Linear -> LayerNorm -> ReLU] x (L-1) -> Linear
# ----------------------------------------------------------------------------
def _make_fused_mlp_kernel(num_layers, hidden_true_dims):
    """Builds the fused kernel body for a fixed layer count / true widths."""

    def kernel(*refs):
        x_ref, out_ref = refs[0], refs[-1]
        p = refs[1:-1]
        h = x_ref[...]                       # (TILE_N, d_in true width), bf16
        r = 0
        for i in range(num_layers - 1):
            w_ref, b_ref, g_ref, beta_ref = p[r], p[r + 1], p[r + 2], p[r + 3]
            r += 4
            # Linear on the MXU, f32 accumulation, f32 bias add.
            y = jnp.dot(h, w_ref[...], preferred_element_type=jnp.float32)
            y = y + b_ref[...]
            # LayerNorm over the TRUE feature count.  Padded lanes of y are
            # exactly 0 (zero-padded W columns & bias), so both sums are exact
            # with no lane mask; variance via E[y^2] - mean^2.
            inv_d = 1.0 / hidden_true_dims[i]
            s1 = jnp.sum(y, axis=-1, keepdims=True)
            s2 = jnp.sum(y * y, axis=-1, keepdims=True)
            mean = s1 * inv_d
            var = jnp.maximum(s2 * inv_d - mean * mean, 0.0)
            yn = (y - mean) * lax.rsqrt(var + LN_EPS)
            yn = yn * g_ref[...] + beta_ref[...]      # padding re-zeroed here
            # ReLU, then back to the MXU input dtype for the next matmul.
            h = jnp.maximum(yn, 0.0).astype(MXU_DTYPE)
        # Final plain linear; lane-dense bf16 store.
        w_ref, b_ref = p[r], p[r + 1]
        y = jnp.dot(h, w_ref[...], preferred_element_type=jnp.float32)
        out_ref[...] = (y + b_ref[...]).astype(out_ref.dtype)

    return kernel


# ----------------------------------------------------------------------------
# Tiling: row tile (multiple of 8 sublanes), >= 2 grid steps, even step count
# so both v7x TensorCores always get work.  Default tile target 2048 rows.
# ----------------------------------------------------------------------------
def _choose_tiling(n, tile_n=None):
    target = 2048 if tile_n is None else int(tile_n)
    target = max(SUBLANE, _round_up(target, SUBLANE))
    steps = max(2, -(-n // target))
    if steps % 2:
        steps += 1
    tile = max(SUBLANE, _round_up(-(-n // steps), SUBLANE))
    return tile, steps, steps * tile


def sparse_mlp_forward(params, x, *, tile_n=None):
    """Fused SparseMLP forward: one pallas_call, batch-tiled grid."""
    n, d_in = x.shape
    num_layers = len(params)
    assert d_in == params[0]["d_in"]
    hidden_p = params[0]["w_t"].shape[1]
    d_out_true = params[-1]["d_out"]
    d_out_p = params[-1]["w_t"].shape[1]

    tile_n, steps, n_pad = _choose_tiling(n, tile_n)

    # Input goes in at its TRUE feature width (no 16->128 lane-pad HBM pass);
    # single bf16 cast halves input DMA.  Rows are padded only if the even-
    # step grid requires it.  Padded rows produce finite garbage (LN of a
    # constant row) that is sliced off below.
    xb = x.astype(MXU_DTYPE)
    if n_pad != n:
        xb = jnp.pad(xb, ((0, n_pad - n), (0, 0)))

    hidden_true_dims = [params[i]["d_out"] for i in range(num_layers - 1)]

    def resident(shape):
        # Same block every grid step -> DMA'd once, stays resident in VMEM.
        return pl.BlockSpec(shape, lambda i: (0, 0))

    flat_inputs = [xb]
    in_specs = [pl.BlockSpec((tile_n, d_in), lambda i: (i, 0))]
    for li, layer in enumerate(params):
        flat_inputs += [layer["w_t"], layer["b"]]
        in_specs += [resident(layer["w_t"].shape), resident(layer["b"].shape)]
        if li < num_layers - 1:
            flat_inputs += [layer["gamma"], layer["beta"]]
            in_specs += [resident(layer["gamma"].shape),
                         resident(layer["beta"].shape)]
    param_bytes = sum(int(a.size) * a.dtype.itemsize for a in flat_inputs[1:])

    # VMEM budget: raise the scoped limit so large row tiles are legal on
    # v5e's 16 MiB default; clamp at v7x's 64 MiB physical VMEM.
    per_row = (2 * d_in * 2            # bf16 input tile, double-buffered
               + 2 * d_out_p * 2       # bf16 output tile, double-buffered
               + 8 * hidden_p * 4)     # generous: f32 LN temps + bf16 act
    vmem_need = tile_n * per_row + 2 * param_bytes + (2 << 20)
    vmem_limit = int(min(max(vmem_need, 32 << 20), 64 << 20))

    # Cost estimate so XLA can schedule surrounding ops around the call.
    flops = sum(2 * n_pad * layer["w_t"].shape[0] * layer["w_t"].shape[1]
                for layer in params)
    bytes_accessed = n_pad * d_in * 2 + n_pad * d_out_p * 2 + param_bytes
    cost = pl.CostEstimate(flops=flops,
                           transcendentals=n_pad * (num_layers - 1),
                           bytes_accessed=bytes_accessed)

    out = pl.pallas_call(
        _make_fused_mlp_kernel(num_layers, hidden_true_dims),
        out_shape=jax.ShapeDtypeStruct((n_pad, d_out_p), OUT_DTYPE),
        grid=(steps,),
        in_specs=in_specs,
        out_specs=pl.BlockSpec((tile_n, d_out_p), lambda i: (i, 0)),
        compiler_params=pltpu.CompilerParams(
            dimension_semantics=("parallel",),
            vmem_limit_bytes=vmem_limit),
        cost_estimate=cost,
    )(*flat_inputs)

    # TODO(synk): for very small out_dim, a true-width (masked-store) output
    # block could skip this slice; kept lane-dense per the review's default.
    return out[:n, :d_out_true]


# ----------------------------------------------------------------------------
# Pure-JAX reference mirroring the kernel numerics (bf16 matmul inputs, f32
# accumulation, f32 centered LayerNorm) on the un-padded logical shapes.  The
# kernel additionally rounds its final output to bf16 and uses the
# E[y^2]-mean^2 variance form, hence the ~1e-2 comparison tolerance.
# ----------------------------------------------------------------------------
def sparse_mlp_reference(params, x):
    num_layers = len(params)
    h = x.astype(MXU_DTYPE)
    for i in range(num_layers):
        p = params[i]
        d_in, d_out = p["d_in"], p["d_out"]
        w = p["w_t"][:d_in, :d_out]
        y = jnp.dot(h, w, preferred_element_type=jnp.float32) + p["b"][:, :d_out]
        if i == num_layers - 1:
            return y
        mean = jnp.mean(y, axis=-1, keepdims=True)
        cent = y - mean
        var = jnp.mean(cent * cent, axis=-1, keepdims=True)
        yn = cent * lax.rsqrt(var + LN_EPS)
        yn = yn * p["gamma"][:, :d_out] + p["beta"][:, :d_out]
        h = jnp.maximum(yn, 0.0).astype(MXU_DTYPE)


if __name__ == "__main__":
    key = jax.random.PRNGKey(0)
    k_param, k_x = jax.random.split(key)

    # Small shapes consistent with the module: x is [batch, in_dim].
    batch, in_dim, hidden_dim, out_dim, num_layers = 50, 16, 32, 8, 3

    params = init_sparse_mlp(k_param, in_dim, hidden_dim, out_dim, num_layers)
    x = jax.random.normal(k_x, (batch, in_dim), jnp.float32)

    ref = np.asarray(sparse_mlp_reference(params, x))

    # Default tiling: the even-step rule gives grid=(2,) even at batch=50,
    # so both v7x TensorCores are exercised.
    out = jax.block_until_ready(sparse_mlp_forward(params, x))
    assert out.shape == (batch, out_dim)
    np.testing.assert_allclose(np.asarray(out.astype(jnp.float32)), ref,
                               rtol=2e-2, atol=2e-2)

    # Explicit small tile -> grid=(4,) with row padding: exercises the
    # multi-step pipelined path.
    out2 = jax.block_until_ready(sparse_mlp_forward(params, x, tile_n=16))
    np.testing.assert_allclose(np.asarray(out2.astype(jnp.float32)), ref,
                               rtol=2e-2, atol=2e-2)

    print("KERNEL_OK")
</pallas_src>

<mosaic_0001>
module attributes {stable_mosaic.version = 11 : i64} {
  func.func @kernel(%arg0: i32, %arg1: memref<32x16xbf16, #tpu.memory_space<vmem>>, %arg2: memref<16x128xbf16, #tpu.memory_space<vmem>>, %arg3: memref<1x128xf32, #tpu.memory_space<vmem>>, %arg4: memref<1x128xf32, #tpu.memory_space<vmem>>, %arg5: memref<1x128xf32, #tpu.memory_space<vmem>>, %arg6: memref<128x128xbf16, #tpu.memory_space<vmem>>, %arg7: memref<1x128xf32, #tpu.memory_space<vmem>>, %arg8: memref<1x128xf32, #tpu.memory_space<vmem>>, %arg9: memref<1x128xf32, #tpu.memory_space<vmem>>, %arg10: memref<128x128xbf16, #tpu.memory_space<vmem>>, %arg11: memref<1x128xf32, #tpu.memory_space<vmem>>, %arg12: memref<32x128xbf16, #tpu.memory_space<vmem>>) attributes {dimension_semantics = [#tpu.dimension_semantics<parallel>], iteration_bounds = array<i64: 2>, scalar_prefetch = 0 : i64, scratch_operands = 0 : i64, tpu.core_type = #tpu.core_type<tc>, window_params = [{transform_indices = @transform_0, window_bounds = array<i64: 32, 16>}, {pipeline_mode = #tpu.pipeline_mode<synchronous>, transform_indices = @transform_1, window_bounds = array<i64: 16, 128>}, {pipeline_mode = #tpu.pipeline_mode<synchronous>, transform_indices = @transform_2, window_bounds = array<i64: 1, 128>}, {pipeline_mode = #tpu.pipeline_mode<synchronous>, transform_indices = @transform_3, window_bounds = array<i64: 1, 128>}, {pipeline_mode = #tpu.pipeline_mode<synchronous>, transform_indices = @transform_4, window_bounds = array<i64: 1, 128>}, {pipeline_mode = #tpu.pipeline_mode<synchronous>, transform_indices = @transform_5, window_bounds = array<i64: 128, 128>}, {pipeline_mode = #tpu.pipeline_mode<synchronous>, transform_indices = @transform_6, window_bounds = array<i64: 1, 128>}, {pipeline_mode = #tpu.pipeline_mode<synchronous>, transform_indices = @transform_7, window_bounds = array<i64: 1, 128>}, {pipeline_mode = #tpu.pipeline_mode<synchronous>, transform_indices = @transform_8, window_bounds = array<i64: 1, 128>}, {pipeline_mode = #tpu.pipeline_mode<synchronous>, transform_indices = @transform_9, window_bounds = array<i64: 128, 128>}, {pipeline_mode = #tpu.pipeline_mode<synchronous>, transform_indices = @transform_10, window_bounds = array<i64: 1, 128>}, {transform_indices = @transform_11, window_bounds = array<i64: 32, 128>}]} {
    %c0 = arith.constant 0 : index
    %c0_0 = arith.constant 0 : index
    %0 = vector.load %arg1[%c0, %c0_0] : memref<32x16xbf16, #tpu.memory_space<vmem>>, vector<32x16xbf16>
    %c0_1 = arith.constant 0 : index
    %c0_2 = arith.constant 0 : index
    %1 = vector.load %arg2[%c0_1, %c0_2] : memref<16x128xbf16, #tpu.memory_space<vmem>>, vector<16x128xbf16>
    %cst = arith.constant dense<0.000000e+00> : vector<32x128xf32>
    %2 = tpu.matmul %0, %1, %cst {dimension_numbers = #tpu.dot_dimension_numbers<[1], [0], [0], [1], [0, 0, 1, 1], [], []>} : vector<32x16xbf16>, vector<16x128xbf16>, vector<32x128xf32> -> vector<32x128xf32>
    %c0_3 = arith.constant 0 : index
    %c0_4 = arith.constant 0 : index
    %3 = vector.load %arg3[%c0_3, %c0_4] : memref<1x128xf32, #tpu.memory_space<vmem>>, vector<1x128xf32>
    %4 = vector.broadcast %3 : vector<1x128xf32> to vector<32x128xf32>
    %5 = arith.addf %2, %4 : vector<32x128xf32>
    %cst_5 = arith.constant dense<0.000000e+00> : vector<32xf32>
    %6 = vector.multi_reduction <add>, %5, %cst_5 [1] : vector<32x128xf32> to vector<32xf32>
    %7 = vector.shape_cast %6 : vector<32xf32> to vector<32x1xf32>
    %8 = arith.mulf %5, %5 : vector<32x128xf32>
    %cst_6 = arith.constant dense<0.000000e+00> : vector<32xf32>
    %9 = vector.multi_reduction <add>, %8, %cst_6 [1] : vector<32x128xf32> to vector<32xf32>
    %10 = vector.shape_cast %9 : vector<32xf32> to vector<32x1xf32>
    %cst_7 = arith.constant 3.125000e-02 : f32
    %11 = vector.broadcast %cst_7 : f32 to vector<32x1xf32>
    %12 = arith.mulf %7, %11 : vector<32x1xf32>
    %cst_8 = arith.constant 3.125000e-02 : f32
    %13 = vector.broadcast %cst_8 : f32 to vector<32x1xf32>
    %14 = arith.mulf %10, %13 : vector<32x1xf32>
    %15 = arith.mulf %12, %12 : vector<32x1xf32>
    %16 = arith.subf %14, %15 : vector<32x1xf32>
    %cst_9 = arith.constant 0.000000e+00 : f32
    %17 = vector.broadcast %cst_9 : f32 to vector<32x1xf32>
    %18 = arith.maximumf %16, %17 : vector<32x1xf32>
    %19 = vector.broadcast %12 : vector<32x1xf32> to vector<32x128xf32>
    %20 = arith.subf %5, %19 : vector<32x128xf32>
    %cst_10 = arith.constant 9.99999974E-6 : f32
    %21 = vector.broadcast %cst_10 : f32 to vector<32x1xf32>
    %22 = arith.addf %18, %21 : vector<32x1xf32>
    %23 = math.rsqrt %22 : vector<32x1xf32>
    %24 = vector.broadcast %23 : vector<32x1xf32> to vector<32x128xf32>
    %25 = arith.mulf %20, %24 : vector<32x128xf32>
    %c0_11 = arith.constant 0 : index
    %c0_12 = arith.constant 0 : index
    %26 = vector.load %arg4[%c0_11, %c0_12] : memref<1x128xf32, #tpu.memory_space<vmem>>, vector<1x128xf32>
    %27 = vector.broadcast %26 : vector<1x128xf32> to vector<32x128xf32>
    %28 = arith.mulf %25, %27 : vector<32x128xf32>
    %c0_13 = arith.constant 0 : index
    %c0_14 = arith.constant 0 : index
    %29 = vector.load %arg5[%c0_13, %c0_14] : memref<1x128xf32, #tpu.memory_space<vmem>>, vector<1x128xf32>
    %30 = vector.broadcast %29 : vector<1x128xf32> to vector<32x128xf32>
    %31 = arith.addf %28, %30 : vector<32x128xf32>
    %cst_15 = arith.constant 0.000000e+00 : f32
    %32 = vector.broadcast %cst_15 : f32 to vector<32x128xf32>
    %33 = arith.maximumf %31, %32 : vector<32x128xf32>
    %34 = arith.truncf %33 : vector<32x128xf32> to vector<32x128xbf16>
    %c0_16 = arith.constant 0 : index
    %c0_17 = arith.constant 0 : index
    %35 = vector.load %arg6[%c0_16, %c0_17] : memref<128x128xbf16, #tpu.memory_space<vmem>>, vector<128x128xbf16>
    %cst_18 = arith.constant dense<0.000000e+00> : vector<32x128xf32>
    %36 = tpu.matmul %34, %35, %cst_18 {dimension_numbers = #tpu.dot_dimension_numbers<[1], [0], [0], [1], [0, 0, 1, 1], [], []>} : vector<32x128xbf16>, vector<128x128xbf16>, vector<32x128xf32> -> vector<32x128xf32>
    %c0_19 = arith.constant 0 : index
    %c0_20 = arith.constant 0 : index
    %37 = vector.load %arg7[%c0_19, %c0_20] : memref<1x128xf32, #tpu.memory_space<vmem>>, vector<1x128xf32>
    %38 = vector.broadcast %37 : vector<1x128xf32> to vector<32x128xf32>
    %39 = arith.addf %36, %38 : vector<32x128xf32>
    %cst_21 = arith.constant dense<0.000000e+00> : vector<32xf32>
    %40 = vector.multi_reduction <add>, %39, %cst_21 [1] : vector<32x128xf32> to vector<32xf32>
    %41 = vector.shape_cast %40 : vector<32xf32> to vector<32x1xf32>
    %42 = arith.mulf %39, %39 : vector<32x128xf32>
    %cst_22 = arith.constant dense<0.000000e+00> : vector<32xf32>
    %43 = vector.multi_reduction <add>, %42, %cst_22 [1] : vector<32x128xf32> to vector<32xf32>
    %44 = vector.shape_cast %43 : vector<32xf32> to vector<32x1xf32>
    %cst_23 = arith.constant 3.125000e-02 : f32
    %45 = vector.broadcast %cst_23 : f32 to vector<32x1xf32>
    %46 = arith.mulf %41, %45 : vector<32x1xf32>
    %cst_24 = arith.constant 3.125000e-02 : f32
    %47 = vector.broadcast %cst_24 : f32 to vector<32x1xf32>
    %48 = arith.mulf %44, %47 : vector<32x1xf32>
    %49 = arith.mulf %46, %46 : vector<32x1xf32>
    %50 = arith.subf %48, %49 : vector<32x1xf32>
    %cst_25 = arith.constant 0.000000e+00 : f32
    %51 = vector.broadcast %cst_25 : f32 to vector<32x1xf32>
    %52 = arith.maximumf %50, %51 : vector<32x1xf32>
    %53 = vector.broadcast %46 : vector<32x1xf32> to vector<32x128xf32>
    %54 = arith.subf %39, %53 : vector<32x128xf32>
    %cst_26 = arith.constant 9.99999974E-6 : f32
    %55 = vector.broadcast %cst_26 : f32 to vector<32x1xf32>
    %56 = arith.addf %52, %55 : vector<32x1xf32>
    %57 = math.rsqrt %56 : vector<32x1xf32>
    %58 = vector.broadcast %57 : vector<32x1xf32> to vector<32x128xf32>
    %59 = arith.mulf %54, %58 : vector<32x128xf32>
    %c0_27 = arith.constant 0 : index
    %c0_28 = arith.constant 0 : index
    %60 = vector.load %arg8[%c0_27, %c0_28] : memref<1x128xf32, #tpu.memory_space<vmem>>, vector<1x128xf32>
    %61 = vector.broadcast %60 : vector<1x128xf32> to vector<32x128xf32>
    %62 = arith.mulf %59, %61 : vector<32x128xf32>
    %c0_29 = arith.constant 0 : index
    %c0_30 = arith.constant 0 : index
    %63 = vector.load %arg9[%c0_29, %c0_30] : memref<1x128xf32, #tpu.memory_space<vmem>>, vector<1x128xf32>
    %64 = vector.broadcast %63 : vector<1x128xf32> to vector<32x128xf32>
    %65 = arith.addf %62, %64 : vector<32x128xf32>
    %cst_31 = arith.constant 0.000000e+00 : f32
    %66 = vector.broadcast %cst_31 : f32 to vector<32x128xf32>
    %67 = arith.maximumf %65, %66 : vector<32x128xf32>
    %68 = arith.truncf %67 : vector<32x128xf32> to vector<32x128xbf16>
    %c0_32 = arith.constant 0 : index
    %c0_33 = arith.constant 0 : index
    %69 = vector.load %arg10[%c0_32, %c0_33] : memref<128x128xbf16, #tpu.memory_space<vmem>>, vector<128x128xbf16>
    %cst_34 = arith.constant dense<0.000000e+00> : vector<32x128xf32>
    %70 = tpu.matmul %68, %69, %cst_34 {dimension_numbers = #tpu.dot_dimension_numbers<[1], [0], [0], [1], [0, 0, 1, 1], [], []>} : vector<32x128xbf16>, vector<128x128xbf16>, vector<32x128xf32> -> vector<32x128xf32>
    %c0_35 = arith.constant 0 : index
    %c0_36 = arith.constant 0 : index
    %71 = vector.load %arg11[%c0_35, %c0_36] : memref<1x128xf32, #tpu.memory_space<vmem>>, vector<1x128xf32>
    %72 = vector.broadcast %71 : vector<1x128xf32> to vector<32x128xf32>
    %73 = arith.addf %70, %72 : vector<32x128xf32>
    %74 = arith.truncf %73 : vector<32x128xf32> to vector<32x128xbf16>
    %c0_37 = arith.constant 0 : index
    %c0_38 = arith.constant 0 : index
    %75 = vector.load %arg12[%c0_37, %c0_38] : memref<32x128xbf16, #tpu.memory_space<vmem>>, vector<32x128xbf16>
    tpu.vector_store %arg12[%c0_37, %c0_38], %74 {strides = array<i32>} : memref<32x128xbf16, #tpu.memory_space<vmem>>, vector<32x128xbf16>,
    return
  }
  func.func @transform_0(%arg0: i32) -> (i32, i32) {
    %c0_i32 = arith.constant 0 : i32
    %c0_i32_0 = arith.constant 0 : i32
    return %arg0, %c0_i32 : i32, i32
  }
  func.func @transform_1(%arg0: i32) -> (i32, i32) {
    %c0_i32 = arith.constant 0 : i32
    %c0_i32_0 = arith.constant 0 : i32
    %c0_i32_1 = arith.constant 0 : i32
    return %c0_i32, %c0_i32_0 : i32, i32
  }
  func.func @transform_2(%arg0: i32) -> (i32, i32) {
    %c0_i32 = arith.constant 0 : i32
    %c0_i32_0 = arith.constant 0 : i32
    %c0_i32_1 = arith.constant 0 : i32
    return %c0_i32, %c0_i32_0 : i32, i32
  }
  func.func @transform_3(%arg0: i32) -> (i32, i32) {
    %c0_i32 = arith.constant 0 : i32
    %c0_i32_0 = arith.constant 0 : i32
    %c0_i32_1 = arith.constant 0 : i32
    return %c0_i32, %c0_i32_0 : i32, i32
  }
  func.func @transform_4(%arg0: i32) -> (i32, i32) {
    %c0_i32 = arith.constant 0 : i32
    %c0_i32_0 = arith.constant 0 : i32
    %c0_i32_1 = arith.constant 0 : i32
    return %c0_i32, %c0_i32_0 : i32, i32
  }
  func.func @transform_5(%arg0: i32) -> (i32, i32) {
    %c0_i32 = arith.constant 0 : i32
    %c0_i32_0 = arith.constant 0 : i32
    %c0_i32_1 = arith.constant 0 : i32
    return %c0_i32, %c0_i32_0 : i32, i32
  }
  func.func @transform_6(%arg0: i32) -> (i32, i32) {
    %c0_i32 = arith.constant 0 : i32
    %c0_i32_0 = arith.constant 0 : i32
    %c0_i32_1 = arith.constant 0 : i32
    return %c0_i32, %c0_i32_0 : i32, i32
  }
  func.func @transform_7(%arg0: i32) -> (i32, i32) {
    %c0_i32 = arith.constant 0 : i32
    %c0_i32_0 = arith.constant 0 : i32
    %c0_i32_1 = arith.constant 0 : i32
    return %c0_i32, %c0_i32_0 : i32, i32
  }
  func.func @transform_8(%arg0: i32) -> (i32, i32) {
    %c0_i32 = arith.constant 0 : i32
    %c0_i32_0 = arith.constant 0 : i32
    %c0_i32_1 = arith.constant 0 : i32
    return %c0_i32, %c0_i32_0 : i32, i32
  }
  func.func @transform_9(%arg0: i32) -> (i32, i32) {
    %c0_i32 = arith.constant 0 : i32
    %c0_i32_0 = arith.constant 0 : i32
    %c0_i32_1 = arith.constant 0 : i32
    return %c0_i32, %c0_i32_0 : i32, i32
  }
  func.func @transform_10(%arg0: i32) -> (i32, i32) {
    %c0_i32 = arith.constant 0 : i32
    %c0_i32_0 = arith.constant 0 : i32
    %c0_i32_1 = arith.constant 0 : i32
    return %c0_i32, %c0_i32_0 : i32, i32
  }
  func.func @transform_11(%arg0: i32) -> (i32, i32) {
    %c0_i32 = arith.constant 0 : i32
    %c0_i32_0 = arith.constant 0 : i32
    return %arg0, %c0_i32 : i32, i32
  }
}

</mosaic_0001>

<bundles_post_ra>
// kernel: tpu_custom_call.1
= control target key start
LH: loop header
LB: loop body
LE: loop exit
PB: predicated region body
PF: predicated region fallthrough
CT: control target
= control target key end

     0   :  { %16 = vsyncpa [#allocation3], 0  ;;  %s1665_s0 = inlined_call_operand.vmem [shape: bf16[64,16], index: 0, kind: input, shape index: {}]   ;;  %s1666_s1 = inlined_call_operand.vmem [shape: bf16[16,128], index: 1, kind: input, shape index: {}]   ;;  %s1667_s2 = inlined_call_operand.vmem [shape: f32[1,128], index: 2, kind: input, shape index: {}]   ;;  %s1668_s3 = inlined_call_operand.vmem [shape: f32[1,128], index: 3, kind: input, shape index: {}]   ;;  %s1669_s4 = inlined_call_operand.vmem [shape: f32[1,128], index: 4, kind: input, shape index: {}]   ;;  %s1670_s5 = inlined_call_operand.hbm [shape: bf16[128,128], index: 5, kind: input, shape index: {}]   ;;  %s1671_s6 = inlined_call_operand.vmem [shape: f32[1,128], index: 6, kind: input, shape index: {}]   ;;  %s1672_s7 = inlined_call_operand.vmem [shape: f32[1,128], index: 7, kind: input, shape index: {}]   ;;  %s1673_s8 = inlined_call_operand.vmem [shape: f32[1,128], index: 8, kind: input, shape index: {}]   ;;  %s1674_s9 = inlined_call_operand.hbm [shape: bf16[128,128], index: 9, kind: input, shape index: {}]   ;;  %s1675_s10 = inlined_call_operand.vmem [shape: f32[1,128], index: 10, kind: input, shape index: {}]   ;;  %s1676_s11 = inlined_call_operand.hbm [shape: bf16[64,128], index: 11, kind: output, shape index: {}]  }
   0x1   :  { %17 = vsyncpa [#allocation6], 0 }
   0x2   :  { %18 = vsyncpa [#allocation4], 0 }
   0x3   :  { %20 = vsyncpa [#allocation4 + $0x1], 0  ;;  %s1451_s17 = smov 0   ;;  %s1453_s18 = smov 0  }
   0x4   :  { %s1455_s19 = smov 0   ;;  %s1457_s20 = smov 0  }
   0x5 LB: > { %s1472_s21 = sadd.s32 4294967295, %s1382_s20   ;;  %s1030_s22 = sadd.s32 4294967294, %s1382_s20   ;;  %s1382_s20 = sphi %s1457_s20, %s1692_s20   ;;  %s1378_s19 = sphi %s1455_s19, %s1691_s19   ;;  %s1374_s18 = sphi %s1453_s18, %s1690_s18   ;;  %s1370_s17 = sphi %s1451_s17, %s1689_s17  }
   0x6   : > { %s1476_s23 = sadd.s32 1, %s1382_s20   ;;  %s269_s24 = sadd.s32 1, %s1378_s19 }
   0x7   : > { %s266_s25 = ssub.s32 %s1382_s20, %s1476_s23  ;;  %p279_p0 = scmp.ne.s32.totalorder %s1378_s19, %s1374_s18 }
   0x8   : > { %p267_p1 = scmp.eq.s32.totalorder %s266_s25, 0  ;;  %p280_p2 = scmp.eq.s32.totalorder %s1472_s21, 1 }
   0x9   : > { %p285_p3 = scmp.ne.s32.totalorder %s1374_s18, %s1370_s17  ;;  %p286_p4 = scmp.eq.s32.totalorder %s1030_s22, 1 }
   0xa   : > { %s1487_s26 = scalar_select %p267_p1, %s1378_s19, %s269_s24  }
   0xb   : > { %p1489_p5 = por %p280_p2, %p279_p0  ;;  %p1493_p6 = por %p286_p4, %p285_p3 }
   0xc   : > { %1678 = sst [smem:[#allocation11_spill]] %s1487_s26  ;;  %p1031_p7 = scmp.ge.s32.totalorder %s1382_s20, 1 }
   0xd   : > { %s1680_s28 = scalar_select %p1493_p6, 1, 0 }
   0xe   : > { %p293_p8 = scmp.lt.s32.totalorder %s1382_s20, 3  ;;  %p1677_p9 = scmp.eq.s32.totalorder %s1472_s21, 0 }
   0xf   : > { %s1384_s30 = smov [#allocation2]   ;;  %s1385_s14 = smov [#allocation5]  }
  0x10   : > { %p1500_p10 = pnand %p1031_p7, %p293_p8  ;;  %s317_s12 = sshll.u32 %s1384_s30, 4  ;;  %s318_s12 = int_to_ptr.vmem [resolvable:$true] %s317_s12 }
  0x11   : > { %s339_s15 = sshll.u32 %s1385_s14, 4  ;;  %s1273_s16 = scalar_lea.vmem %s318_s12, 1024  ;;  %s340_s15 = int_to_ptr.vmem [resolvable:$true] %s339_s15 }
  0x12   : > { %p1173_p11 = pneg %p1500_p10  ;;  %p1274_p0 = scmp.ne.s32.totalorder %s318_s12, %s1273_s16 }
  0x13   : > { %p1281_p3 = scmp.lt.s32.totalorder %s318_s12, %s318_s12  ;;  %p1282_p4 = scmp.lt.s32.totalorder %s1273_s16, %s1273_s16 }
  0x14   : > { %p1508_p12 = pnand %p1677_p9, %p1173_p11 }
  0x15   : > { %p1283_p7 = por %p1282_p4, %p1281_p3 }
  0x16   : > { %p1264_p13 = pneg %p1508_p12 }
  0x18   : > { %p1276_p1 = pnand %p1274_p0, %p1264_p13 }
  0x1a   : > { %p1277_p2 = pneg %p1276_p1 }
  0x1c   : > { %p1284_p8 = pnand %p1283_p7, %p1277_p2 }
  0x1e   : > { %1287 = shalt.err (!%p1284_p8)
}
  0x1f   : > { %s1386_s22 = smov 64   ;;  %s1387_s24 = smov 4  }
  0x20   : > { %1176 = dma.hbm_to_vmem [thread:$0]  (!%p1508_p12), %s1670_s5, 1024, %s318_s12, [#allocation3], %s1386_s22, %s1386_s22, %s1387_s24  }
  0x21   : > { %s1299_s14 = scalar_lea.vmem %s340_s15, 1024  ;;  %p1307_p9 = scmp.lt.s32.totalorder %s340_s15, %s340_s15 }
  0x22   : > { %p1300_p11 = scmp.ne.s32.totalorder %s340_s15, %s1299_s14  ;;  %p1308_p6 = scmp.lt.s32.totalorder %s1299_s14, %s1299_s14 }
  0x24   : > { %p1302_p0 = pnand %p1300_p11, %p1264_p13  ;;  %p1309_p3 = por %p1308_p6, %p1307_p9 }
  0x26   : > { %p1303_p1 = pneg %p1302_p0 }
  0x28   : > { %p1310_p2 = pnand %p1309_p3, %p1303_p1 }
  0x2a   : > { %1313 = shalt.err (!%p1310_p2)
}
  0x2b   : > { %1179 = dma.hbm_to_vmem [thread:$0]  (!%p1508_p12), %s1674_s9, 1024, %s340_s15, [#allocation6], %s1386_s22, %s1386_s22, %s1387_s24  }
  0x2c   : > { %367 = sbr.rel (%p1500_p10) target bundleno = 1038 (0x40e), region = 64  ;;  %p1683_p4 = scmp.eq.s32.totalorder (!%p1500_p10), %s1472_s21, 0 }
  0x31   : > { %1357 = dma.done.wait (%p1683_p4), [#allocation3], 1024   ;;  %p1684_p13 = pmov %p1683_p4 }
  0x32   : > { %p1685_p7 = pmov %p1683_p4 }
  0x33   : > { %1359 = vsyncadd (%p1684_p13), [#allocation3], 4294966272 }
  0x34   : > { %1361 = dma.done.wait (%p1685_p7), [#allocation6], 1024   ;;  %p1686_p6 = pmov %p1683_p4 }
  0x35   : > { %s1039_s12 = sshll.u32 %s1472_s21, 2  ;;  %v1227_v0 = vld [vmem:[%s1666_s1] sm:$0xff]   ;;  %vm448_vm0 = vcmask 130048   ;;  %v1230_v16 = vld [vmem:[#allocation2 + $0x38] sm:$0xff]   ;;  %v1231_v17 = vld [vmem:[#allocation2 + $0x30] sm:$0xff]   ;;  %s408_s30 = sand.u32 1, %s1374_s18  }
  0x36   : > { %1363 = vsyncadd (%p1686_p6), [#allocation6], 4294966272  ;;  %p412_p9 = scmp.lt.s32.totalorder %s1039_s12, 7  ;;  %1117 = vmatprep.subr.bf16.mxu0 %v1227_v0  ;;  %v1041_v3 = vld [vmem:[%s1667_s2] ss:$0 sm:$0xff]  ;;  %1123 = vmatprep.subr.bf16.mxu1 %v1230_v16  ;;  %v1232_v18 = vld [vmem:[#allocation2 + $0x28] sm:$0xff]  }
  0x37   : > { %1118 = vmatpush3.bf16.msra.mxu0 %v1227_v0  ;;  %1124 = vmatpush3.bf16.msra.mxu1 %v1230_v16  ;;  %v1233_v19 = vld [vmem:[#allocation2 + $0x20] sm:$0xff]   ;;  %v1234_v20 = vld [vmem:[#allocation2 + $0x18] sm:$0xff]   ;;  %v1235_v21 = vld [vmem:[#allocation2 + $0x10] sm:$0xff]   ;;  %s1038_s14 = sshll.u32 %s408_s30, 4  ;;  %s1082_s29 = sshll.u32 %s1472_s21, 8 }
  0x38   : > { %s1694_s12 = smov (!%p412_p9, %s1039_s12), 7  ;;  %1125 = vmatprep.subr.bf16.mxu1 %v1231_v17  ;;  %v1236_v22 = vld [vmem:[#allocation2 + $0x8] sm:$0xff]   ;;  %v1237_v23 = vld [vmem:[#allocation2] sm:$0xff]   ;;  %s1623_s24 = scalar_lea.hbm %s1676_s11, %s1082_s29 }
  0x39   : > { %s1040_s26 = sshll.u32 %s1694_s12, 2  ;;  %v1047_v59 = vld [vmem:[%s1668_s3] ss:$0 sm:$0xff]  ;;  %s1625_s25 = scalar_lea.sflag [#allocation4], %s408_s30 }
  0x3a   : > { %s415_s15 = scalar_lea.vmem %s1665_s0, %s1040_s26  ;;  %v1048_v0 = vld [vmem:[%s1669_s4] ss:$0 sm:$0xff]  ;;  %s410_s26 = scalar_lea.vmem [#allocation7], %s1038_s14 }
  0x3b   : > { %v1228_v1 = vld [vmem:[%s415_s15] sm:$0xff]   ;;  %v1229_v2 = vld [vmem:[%s415_s15 + $0x8] sm:$0xff]   ;;  %1126 = vmatpush3.bf16.msra.mxu1 %v1231_v17  ;;  %s946_s13 = sshll.u32 %s410_s26, 4  ;;  %s1388_s21 = smov [#allocation7]   ;;  %s1618_s13 = int_to_ptr.vmem [resolvable:$true] %s946_s13 }
  0x3c   : > { %1119 = vmatprep.mubr.msk.bf16.mxu0 %vm448_vm0, %v1228_v1  ;;  %1127 = vmatprep.subr.bf16.mxu1 %v1232_v18  ;;  %s1314_s14 = scalar_lea.vmem %s1618_s13, 256  ;;  %s1318_s16 = sshll.u32 %s1388_s21, 4  ;;  %s1319_s16 = int_to_ptr.vmem [resolvable:$false] %s1318_s16 }
  0x3d   : > { %1120 = vmatmul.mubr.msk.bf16.vlgmr.msra.gmra.mxu0 %vm448_vm0, %v1229_v2  ;;  %p1315_p10 = scmp.ne.s32.totalorder %s1618_s13, %s1314_s14  ;;  %s1320_s12 = scalar_lea.vmem %s1319_s16, 512 }
  0x3e   : > { %p1321_p11 = scmp.lt.s32.totalorder %s1618_s13, %s1319_s16  ;;  %p1322_p0 = scmp.lt.s32.totalorder %s1320_s12, %s1314_s14 }
  0x3f   : > { %1128 = vmatpush3.bf16.msra.mxu1 %v1232_v18  ;;  %p1316_p12 = pnand %p1315_p10, %p1489_p5 }
  0x40   : > { %1129 = vmatprep.subr.bf16.mxu1 %v1233_v19  ;;  %p1323_p1 = por %p1322_p0, %p1321_p11 }
  0x41   : > { %p1317_p8 = pneg %p1316_p12 }
  0x43   : > { %1130 = vmatpush3.bf16.msra.mxu1 %v1233_v19  ;;  %p1324_p3 = pnand %p1323_p1, %p1317_p8 }
  0x44   : > { %1131 = vmatprep.subr.bf16.mxu1 %v1234_v20 }
  0x47   : > { %1132 = vmatpush3.bf16.msra.mxu1 %v1234_v20 }
  0x48   : > { %1133 = vmatprep.subr.bf16.mxu1 %v1235_v21 }
  0x4b   : > { %1134 = vmatpush3.bf16.msra.mxu1 %v1235_v21 }
  0x4c   : > { %1135 = vmatprep.subr.bf16.mxu1 %v1236_v22 }
  0x4f   : > { %1136 = vmatpush3.bf16.msra.mxu1 %v1236_v22 }
  0x50   : > { %1137 = vmatprep.subr.bf16.mxu1 %v1237_v23 }
  0x53   : > { %1138 = vmatpush3.bf16.msra.mxu1 %v1237_v23 }
  0xfd   : > { %v1121_v4 = vpop.f32.mrf.mxu0 }
  0xfe   : > { %v1550_v5 = vadd.f32 %v1121_v4, %v1041_v3 }
  0xff   : > { %v489_v6 = vpop.f32.mrf.mxu0 }
 0x100   : > { %v1552_v7 = vadd.f32 %v1041_v3, %v489_v6  ;;  %508 = vadd.xlane.f32.xlu1 %v1550_v5  ;;  %v514_v15 = vmul.f32 %v1550_v5, %v1550_v5 }
 0x101   : > { %v1122_v8 = vpop.f32.mrf.mxu0 }
 0x102   : > { %v1555_v9 = vadd.f32 %v1122_v8, %v1041_v3  ;;  %504 = vadd.xlane.f32.xlu0 %v1552_v7  ;;  %v512_v12 = vmul.f32 %v1552_v7, %v1552_v7 }
 0x103   : > { %v492_v10 = vpop.f32.mrf.mxu0 }
 0x104   : > { %v1558_v11 = vadd.f32 %v1041_v3, %v492_v10  ;;  %510 = vadd.xlane.f32.xlu1 %v1555_v9  ;;  %v515_v14 = vmul.f32 %v1555_v9, %v1555_v9 }
 0x106   : > { %516 = vadd.xlane.f32.xlu0 %v512_v12  ;;  %v513_v13 = vmul.f32 %v1558_v11, %v1558_v11 }
 0x108   : > { %518 = vadd.xlane.f32.xlu1 %v513_v13 }
 0x10a   : > { %506 = vadd.xlane.f32.xlu0 %v1558_v11 }
 0x10c   : > { %522 = vadd.xlane.f32.xlu1 %v515_v14 }
 0x10e   : > { %520 = vadd.xlane.f32.xlu0 %v514_v15 }
 0x189   : > { %v509_v24 = vpop.xlane.xlu1 %508 }
 0x18a   : > { %v526_v34 = vmul.f32 0.03125, %v509_v24 }
 0x18b   : > { %v505_v25 = vpop.xlane.xlu0 %504 }
 0x18c   : > { %v524_v26 = vmul.f32 0.03125, %v505_v25  ;;  %v534_v44 = vmul.f32 %v526_v34, %v526_v34  ;;  %v546_v2 = vsub.f32 %v1550_v5, %v526_v34  ;;  %v1049_v5 = vld [vmem:[%s1671_s6] ss:$0 sm:$0xff]  ;;  %v1239_v34 = vld [vmem:[#allocation5 + $0x30] sm:$0xff]  }
 0x18d   : > { %v511_v27 = vpop.xlane.xlu1 %510 }
 0x18e   : > { %v532_v29 = vmul.f32 %v524_v26, %v524_v26  ;;  %v527_v31 = vmul.f32 0.03125, %v511_v27  ;;  %v544_v56 = vsub.f32 %v1552_v7, %v524_v26 }
 0x18f   : > { %v517_v28 = vpop.xlane.xlu0 %516 }
 0x190   : > { %v528_v30 = vmul.f32 0.03125, %v517_v28  ;;  %v535_v38 = vmul.f32 %v527_v31, %v527_v31  ;;  %v547_v63 = vsub.f32 %v1555_v9, %v527_v31 }
 0x191   : > { %v519_v32 = vpop.xlane.xlu1 %518 }
 0x192   : > { %v536_v33 = vsub.f32 %v528_v30, %v532_v29  ;;  %v529_v41 = vmul.f32 0.03125, %v519_v32 }
 0x193   : > { %v507_v35 = vpop.xlane.xlu0 %506 }
 0x194   : > { %v540_v36 = vmax.f32 %v536_v33, 0.0  ;;  %v525_v37 = vmul.f32 0.03125, %v507_v35  ;;  %v1238_v33 = vld [vmem:[#allocation5 + $0x38] sm:$0xff]   ;;  %v1240_v35 = vld [vmem:[#allocation5 + $0x28] sm:$0xff]  }
 0x195   : > { %v523_v39 = vpop.xlane.xlu1 %522  ;;  %1143 = vmatprep.subr.bf16.mxu0 %v1238_v33 }
 0x196   : > { %v548_v40 = vadd.f32 1e-05, %v540_v36  ;;  %v533_v42 = vmul.f32 %v525_v37, %v525_v37  ;;  %v531_v43 = vmul.f32 0.03125, %v523_v39  ;;  %v545_v60 = vsub.f32 %v1558_v11, %v525_v37  ;;  %1144 = vmatpush3.bf16.msra.mxu0 %v1238_v33  ;;  %v1241_v36 = vld [vmem:[#allocation5 + $0x20] sm:$0xff]   ;;  %v1242_v37 = vld [vmem:[#allocation5 + $0x18] sm:$0xff]   ;;  %v1244_v39 = vld [vmem:[#allocation5 + $0x8] sm:$0xff]  }
 0x197   : > { %v521_v45 = vpop.xlane.xlu0 %520  ;;  %1145 = vmatprep.subr.bf16.mxu0 %v1239_v34 }
 0x198   : > { %1246 = vrsqrt.f32 %v548_v40  ;;  %v537_v46 = vsub.f32 %v529_v41, %v533_v42  ;;  %v539_v47 = vsub.f32 %v531_v43, %v535_v38  ;;  %v530_v48 = vmul.f32 0.03125, %v521_v45  ;;  %v1243_v38 = vld [vmem:[#allocation5 + $0x10] sm:$0xff]   ;;  %v1245_v40 = vld [vmem:[#allocation5] sm:$0xff]  }
 0x19a   : > { %v541_v49 = vmax.f32 %v537_v46, 0.0  ;;  %v543_v50 = vmax.f32 %v539_v47, 0.0  ;;  %v538_v51 = vsub.f32 %v530_v48, %v534_v44  ;;  %1146 = vmatpush3.bf16.msra.mxu0 %v1239_v34 }
 0x19b   : > { %1147 = vmatprep.subr.bf16.mxu0 %v1240_v35 }
 0x19c   : > { %v549_v52 = vadd.f32 1e-05, %v541_v49  ;;  %v551_v53 = vadd.f32 1e-05, %v543_v50  ;;  %v542_v54 = vmax.f32 %v538_v51, 0.0 }
 0x19e   : > { %1248 = vrsqrt.f32 %v549_v52  ;;  %v550_v55 = vadd.f32 1e-05, %v542_v54  ;;  %1148 = vmatpush3.bf16.msra.mxu0 %v1240_v35 }
 0x19f   : > { %1250 = vrsqrt.f32 %v551_v53  ;;  %1149 = vmatprep.subr.bf16.mxu0 %v1241_v36 }
 0x1a0   : > { %1252 = vrsqrt.f32 %v550_v55 }
 0x1a2   : > { %1150 = vmatpush3.bf16.msra.mxu0 %v1241_v36 }
 0x1a3   : > { %1151 = vmatprep.subr.bf16.mxu0 %v1242_v37 }
 0x1a5   : > { %v1247_v57 = vpop.eup %1246 }
 0x1a6   : > { %v556_v58 = vmul.f32 %v1247_v57, %v544_v56  ;;  %1152 = vmatpush3.bf16.msra.mxu0 %v1242_v37 }
 0x1a7   : > { %1153 = vmatprep.subr.bf16.mxu0 %v1243_v38 }
 0x1a8   : > { %v567_v61 = vmul.f32 %v1047_v59, %v556_v58 }
 0x1aa   : > { %v578_v8 = vadd.f32 %v1048_v0, %v567_v61  ;;  %1154 = vmatpush3.bf16.msra.mxu0 %v1243_v38  ;;  %v1060_v38 = vld [vmem:[%s1675_s10] ss:$0 sm:$0xff] }
 0x1ab   : > { %v1249_v62 = vpop.eup %1248  ;;  %1155 = vmatprep.subr.bf16.mxu0 %v1244_v39 }
 0x1ac   : > { %v1251_v1 = vpop.eup %1250  ;;  %v557_v3 = vmul.f32 %v1249_v62, %v545_v60  ;;  %v582_v15 = vmax.f32 %v578_v8, 0.0 }
 0x1ad   : > { %v1253_v4 = vpop.eup %1252  ;;  %v559_v6 = vmul.f32 %v1251_v1, %v547_v63 }
 0x1ae   : > { %v568_v7 = vmul.f32 %v1047_v59, %v557_v3  ;;  %v558_v10 = vmul.f32 %v1253_v4, %v546_v2  ;;  %1156 = vmatpush3.bf16.msra.mxu0 %v1244_v39 }
 0x1af   : > { %v570_v12 = vmul.f32 %v1047_v59, %v559_v6  ;;  %1157 = vmatprep.subr.bf16.mxu0 %v1245_v40 }
 0x1b0   : > { %v579_v13 = vadd.f32 %v1048_v0, %v568_v7  ;;  %v569_v11 = vmul.f32 %v1047_v59, %v558_v10 }
 0x1b1   : > { %v581_v14 = vadd.f32 %v1048_v0, %v570_v12 }
 0x1b2   : > { %v583_v16 = vmax.f32 %v579_v13, 0.0  ;;  %v580_v9 = vadd.f32 %v1048_v0, %v569_v11  ;;  %1158 = vmatpush3.bf16.msra.mxu0 %v1245_v40  ;;  %v1058_v11 = vld [vmem:[%s1672_s7] ss:$0 sm:$0xff] }
 0x1b3   : > { %v585_v19 = vmax.f32 %v581_v14, 0.0 }
 0x1b4   : > { %v586_v17 = vpack.c.bf16 %v583_v16, %v582_v15  ;;  %v584_v18 = vmax.f32 %v580_v9, 0.0 }
 0x1b6   : > { %1139 = vmatprep.mubr.bf16.mxu1 %v586_v17  ;;  %v587_v20 = vpack.c.bf16 %v585_v19, %v584_v18  ;;  %v1059_v18 = vld [vmem:[%s1673_s8] ss:$0 sm:$0xff] }
 0x1b8   : > { %1140 = vmatmul.mubr.bf16.vlgmr.msra.gmra.mxu1 %v587_v20 }
 0x278   : > { %v1141_v21 = vpop.f32.mrf.mxu1 }
 0x279   : > { %v1583_v22 = vadd.f32 %v1141_v21, %v1049_v5 }
 0x27a   : > { %v693_v23 = vpop.f32.mrf.mxu1 }
 0x27b   : > { %712 = vadd.xlane.f32.xlu0 %v1583_v22  ;;  %v1586_v25 = vadd.f32 %v1049_v5, %v693_v23  ;;  %v718_v31 = vmul.f32 %v1583_v22, %v1583_v22 }
 0x27c   : > { %v1142_v24 = vpop.f32.mrf.mxu1 }
 0x27d   : > { %v1588_v26 = vadd.f32 %v1142_v24, %v1049_v5  ;;  %v716_v29 = vmul.f32 %v1586_v25, %v1586_v25 }
 0x27e   : > { %v696_v27 = vpop.f32.mrf.mxu1 }
 0x27f   : > { %714 = vadd.xlane.f32.xlu1 %v1588_v26  ;;  %708 = vadd.xlane.f32.xlu0 %v1586_v25  ;;  %v1592_v28 = vadd.f32 %v1049_v5, %v696_v27  ;;  %v719_v32 = vmul.f32 %v1588_v26, %v1588_v26 }
 0x281   : > { %v717_v30 = vmul.f32 %v1592_v28, %v1592_v28 }
 0x283   : > { %710 = vadd.xlane.f32.xlu1 %v1592_v28  ;;  %720 = vadd.xlane.f32.xlu0 %v716_v29 }
 0x287   : > { %722 = vadd.xlane.f32.xlu1 %v717_v30  ;;  %724 = vadd.xlane.f32.xlu0 %v718_v31 }
 0x28b   : > { %726 = vadd.xlane.f32.xlu1 %v719_v32 }
 0x304   : > { %v713_v41 = vpop.xlane.xlu0 %712 }
 0x305   : > { %v730_v45 = vmul.f32 0.03125, %v713_v41 }
 0x307   : > { %v738_v52 = vmul.f32 %v730_v45, %v730_v45  ;;  %v750_v17 = vsub.f32 %v1583_v22, %v730_v45 }
 0x308   : > { %v715_v42 = vpop.xlane.xlu1 %714  ;;  %v709_v43 = vpop.xlane.xlu0 %708 }
 0x309   : > { %v728_v44 = vmul.f32 0.03125, %v709_v43  ;;  %v731_v53 = vmul.f32 0.03125, %v715_v42 }
 0x30b   : > { %v736_v48 = vmul.f32 %v728_v44, %v728_v44  ;;  %v739_v63 = vmul.f32 %v731_v53, %v731_v53  ;;  %v748_v12 = vsub.f32 %v1586_v25, %v728_v44  ;;  %v751_v21 = vsub.f32 %v1588_v26, %v731_v53 }
 0x30c   : > { %v711_v46 = vpop.xlane.xlu1 %710  ;;  %v721_v47 = vpop.xlane.xlu0 %720 }
 0x30d   : > { %v729_v49 = vmul.f32 0.03125, %v711_v46  ;;  %v732_v50 = vmul.f32 0.03125, %v721_v47 }
 0x30f   : > { %v740_v51 = vsub.f32 %v732_v50, %v736_v48  ;;  %v737_v56 = vmul.f32 %v729_v49, %v729_v49  ;;  %v749_v15 = vsub.f32 %v1592_v28, %v729_v49 }
 0x310   : > { %v723_v54 = vpop.xlane.xlu1 %722  ;;  %v725_v55 = vpop.xlane.xlu0 %724 }
 0x311   : > { %v744_v57 = vmax.f32 %v740_v51, 0.0  ;;  %v733_v58 = vmul.f32 0.03125, %v723_v54  ;;  %v734_v59 = vmul.f32 0.03125, %v725_v55 }
 0x313   : > { %v752_v60 = vadd.f32 1e-05, %v744_v57  ;;  %v741_v61 = vsub.f32 %v733_v58, %v737_v56  ;;  %v742_v62 = vsub.f32 %v734_v59, %v738_v52 }
 0x314   : > { %v727_v0 = vpop.xlane.xlu1 %726 }
 0x315   : > { %1254 = vrsqrt.f32 %v752_v60  ;;  %v745_v1 = vmax.f32 %v741_v61, 0.0  ;;  %v746_v2 = vmax.f32 %v742_v62, 0.0  ;;  %v735_v3 = vmul.f32 0.03125, %v727_v0 }
 0x317   : > { %v753_v4 = vadd.f32 1e-05, %v745_v1  ;;  %v754_v6 = vadd.f32 1e-05, %v746_v2  ;;  %v743_v7 = vsub.f32 %v735_v3, %v739_v63 }
 0x319   : > { %1256 = vrsqrt.f32 %v753_v4  ;;  %v747_v8 = vmax.f32 %v743_v7, 0.0 }
 0x31a   : > { %1258 = vrsqrt.f32 %v754_v6 }
 0x31b   : > { %v755_v10 = vadd.f32 1e-05, %v747_v8 }
 0x31d   : > { %1260 = vrsqrt.f32 %v755_v10 }
 0x322   : > { %v1255_v13 = vpop.eup %1254 }
 0x323   : > { %v760_v14 = vmul.f32 %v1255_v13, %v748_v12 }
 0x325   : > { %v771_v16 = vmul.f32 %v1058_v11, %v760_v14 }
 0x326   : > { %v1257_v9 = vpop.eup %1256 }
 0x327   : > { %v1259_v19 = vpop.eup %1258  ;;  %v761_v20 = vmul.f32 %v1257_v9, %v749_v15  ;;  %v782_v24 = vadd.f32 %v1059_v18, %v771_v16 }
 0x328   : > { %v762_v5 = vmul.f32 %v1259_v19, %v750_v17 }
 0x329   : > { %v772_v23 = vmul.f32 %v1058_v11, %v761_v20  ;;  %v786_v30 = vmax.f32 %v782_v24, 0.0 }
 0x32a   : > { %v1261_v25 = vpop.eup %1260  ;;  %v773_v27 = vmul.f32 %v1058_v11, %v762_v5 }
 0x32b   : > { %v783_v29 = vadd.f32 %v1059_v18, %v772_v23  ;;  %v763_v28 = vmul.f32 %v1261_v25, %v751_v21 }
 0x32c   : > { %v784_v22 = vadd.f32 %v1059_v18, %v773_v27 }
 0x32d   : > { %v787_v31 = vmax.f32 %v783_v29, 0.0  ;;  %v774_v32 = vmul.f32 %v1058_v11, %v763_v28 }
 0x32e   : > { %v788_v35 = vmax.f32 %v784_v22, 0.0 }
 0x32f   : > { %v790_v33 = vpack.c.bf16 %v787_v31, %v786_v30  ;;  %v785_v34 = vadd.f32 %v1059_v18, %v774_v32 }
 0x331   : > { %1159 = vmatprep.mubr.bf16.mxu0 %v790_v33  ;;  %v789_v36 = vmax.f32 %v785_v34, 0.0 }
 0x333   : > { %v791_v37 = vpack.c.bf16 %v789_v36, %v788_v35 }
 0x335   : > { %1160 = vmatmul.mubr.bf16.vlgmr.msra.gmra.mxu0 %v791_v37 }
 0x3f5   : > { %v1161_v26 = vpop.f32.mrf.mxu0 }
 0x3f6   : > { %v906_v41 = vadd.f32 %v1161_v26, %v1060_v38 }
 0x3f7   : > { %v897_v39 = vpop.f32.mrf.mxu0 }
 0x3f8   : > { %v898_v44 = vadd.f32 %v1060_v38, %v897_v39 }
 0x3f9   : > { %v1162_v40 = vpop.f32.mrf.mxu0 }
 0x3fa   : > { %v909_v42 = vadd.f32 %v1162_v40, %v1060_v38 }
 0x3fb   : > { %v900_v43 = vpop.f32.mrf.mxu0 }
 0x3fc   : > { %v1091_v45 = vpack.c.bf16 %v909_v42, %v906_v41  ;;  %v901_v46 = vadd.f32 %v1060_v38, %v900_v43 }
 0x3fe   : > { %1093 = vst [vmem:[%s410_s26 + $0x8] sm:$0xff] %v1091_v45   ;;  %v1086_v47 = vpack.c.bf16 %v901_v46, %v898_v44 }
 0x400   : > { %1087 = vst [vmem:[%s410_s26] sm:$0xff] %v1086_v47  }
 0x401   : > { %1327 = shalt.err (!%p1324_p3)
}
 0x402   : > { %s1328_s30 = scalar_lea.hbm %s1623_s24, 256  ;;  %s1332_s15 = scalar_lea.hbm %s1676_s11, 512 }
 0x403   : > { %p1329_p2 = scmp.ne.s32.totalorder %s1623_s24, %s1328_s30  ;;  %p1333_p7 = scmp.lt.s32.totalorder %s1623_s24, %s1676_s11 }
 0x404   : > { %p1334_p6 = scmp.lt.s32.totalorder %s1332_s15, %s1328_s30 }
 0x405   : > { %p1330_p4 = pnand %p1329_p2, %p1489_p5 }
 0x406   : > { %p1335_p9 = por %p1334_p6, %p1333_p7 }
 0x407   : > { %p1331_p13 = pneg %p1330_p4 }
 0x409   : > { %p1336_p10 = pnand %p1335_p9, %p1331_p13 }
 0x40b   : > { %1339 = shalt.err (!%p1336_p10)
}
 0x40c   : > { %s1389_s14 = smov 64   ;;  %s1390_s16 = smov 4  }
 0x40d   : > { %1171 = dma.vmem_to_hbm [thread:$0]  (%p1489_p5), %s1618_s13, 256, %s1623_s24, %s1625_s25, %s1389_s14, %s1389_s14, %s1390_s16  }
 0x40e PF: > { %p1188_p12 = scmp.ge.s32.totalorder %s1382_s20, 2  ;;  %s961_s12 = sand.u32 1, %s1370_s17  }
 0x40f   : > { %p1687_p8 = scmp.ne.s32.totalorder %s1680_s28, 0  ;;  %s962_s30 = scalar_lea.sflag [#allocation4], %s961_s12 }
 0x411   : > { %p1181_p11 = pnand %p1188_p12, %p1687_p8 }
 0x413   : > { %p1182_p0 = pneg %p1181_p11 }
 0x415   : > { %1365 = dma.done.wait (%p1182_p0), %s962_s30, 256  }
 0x416   : > { %1367 = vsyncadd (%p1182_p0), %s962_s30, 4294967040  ;;  %s1688_s26 = sld [smem:[#allocation11_spill]]  ;;  %p23_p1 = scmp.ge.s32.totalorder %s1476_s23, 4  }
 0x417   : > { %s1689_s17 = smov %s1374_s18  ;;  %s1690_s18 = smov %s1378_s19 }
 0x418   : > { %s1692_s20 = smov %s1476_s23  ;;  %25 = sbr.rel (!%p23_p1) target bundleno = 5 (0x5), region = 108 }
 0x41c   : > { %s1691_s19 = smov %s1688_s26 }
 0x41d   :  { %967 = vsyncpa [#allocation3], 1 }
 0x41e   :  { %969 = vsyncpa [#allocation3 + $0x1], 1 }
 0x41f   :  { %970 = vsyncpa [#allocation6], 1 }
 0x420   :  { %971 = vsyncpa [#allocation4], 1 }
 0x421   :  { %973 = vsyncpa [#allocation4 + $0x1], 1 }

</bundles_post_ra>
